<compile_context>
chip_gen: v7x
topology: tpu7x:2x2x1
jax: 0.10.0
libtpu: 0.0.40
codegen_flags: <defaults>
</compile_context>

<pallas_src>
import functools

import jax
import jax.numpy as jnp
from jax.experimental import pallas as pl
from jax.experimental.pallas import tpu as pltpu

IN_FEATURES = 9
HIDDEN = 128
OUT_FEATURES = 9


def _round_up(x, m):
    return (x + m - 1) // m * m


def dqn_mlp_kernel(x_ref, w1_ref, b1_ref, w2_ref, b2_ref, w3_ref, b3_ref,
                   out_ref):
    """Fused 3-layer MLP on one (tb, 9) batch tile.

    x_ref : (tb, 9)  f32 input tile
    w1    : (9, 128) bf16     b1: (1, 128) bf16
    w2    : (128,128) bf16    b2: (1, 128) bf16
    w3    : (128, 9) bf16     b3: (1, 9)   f32
    out   : (tb, 9)  f32
    """
    x = x_ref[...].astype(jnp.bfloat16)                                # (tb, 9)

    # fc1 + ReLU  (MXU f32 accumulation, bf16 VPU epilogue)
    h1 = jnp.dot(x, w1_ref[...], preferred_element_type=jnp.float32)   # (tb,128)
    h1 = jnp.maximum(h1.astype(jnp.bfloat16) + b1_ref[...], 0.0)

    # fc2 + ReLU
    h2 = jnp.dot(h1, w2_ref[...], preferred_element_type=jnp.float32)  # (tb,128)
    h2 = jnp.maximum(h2.astype(jnp.bfloat16) + b2_ref[...], 0.0)

    # fc3 (final bias-add in f32 for output accuracy)
    h3 = jnp.dot(h2, w3_ref[...], preferred_element_type=jnp.float32)  # (tb, 9)
    out_ref[...] = (h3 + b3_ref[...]).astype(out_ref.dtype)


def prepare_params(params):
    """One-time bf16 cast of (in, out)-convention weights.

    NOTE: torch.nn.Linear stores weights as (out, in); weights loaded from a
    real PyTorch state_dict must be transposed before being passed here.
    """
    w1 = params["w1"].astype(jnp.bfloat16)   # (9, 128)
    b1 = params["b1"].astype(jnp.bfloat16)   # (1, 128)
    w2 = params["w2"].astype(jnp.bfloat16)   # (128, 128)
    b2 = params["b2"].astype(jnp.bfloat16)   # (1, 128)
    w3 = params["w3"].astype(jnp.bfloat16)   # (128, 9)
    b3 = params["b3"].astype(jnp.float32)    # (1, 9)
    return (w1, b1, w2, b2, w3, b3)


@functools.partial(jax.jit, static_argnames=("block_b",))
def dqn_forward(x, prepared, block_b=1024):
    """x: (B, 9) float32. prepared: output of prepare_params. Returns (B, 9)."""
    w1, b1, w2, b2, w3, b3 = prepared
    B = x.shape[0]

    # Batch tile: multiple of 8 sublanes.  For B > 256, pick a tile that gives
    # grid >= 2 (multiple of 256 for the MXU M dim) so v7x's two TensorCores
    # both get work; cap at block_b to bound per-step VMEM.
    if B <= 256:
        tb = _round_up(B, 8)
    else:
        tb = min(block_b, _round_up(pl.cdiv(B, 2), 256))
    grid = (pl.cdiv(B, tb),)

    flops = 2 * B * (IN_FEATURES * HIDDEN + HIDDEN * HIDDEN
                     + HIDDEN * OUT_FEATURES)
    bytes_accessed = (x.size * x.dtype.itemsize
                      + sum(a.size * a.dtype.itemsize
                            for a in (w1, b1, w2, b2, w3, b3))
                      + B * OUT_FEATURES * 4)

    out = pl.pallas_call(
        dqn_mlp_kernel,
        out_shape=jax.ShapeDtypeStruct((B, OUT_FEATURES), jnp.float32),
        grid=grid,
        in_specs=[
            pl.BlockSpec((tb, IN_FEATURES), lambda i: (i, 0)),          # x tile
            pl.BlockSpec((IN_FEATURES, HIDDEN), lambda i: (0, 0)),      # w1
            pl.BlockSpec((1, HIDDEN), lambda i: (0, 0)),                # b1
            pl.BlockSpec((HIDDEN, HIDDEN), lambda i: (0, 0)),           # w2
            pl.BlockSpec((1, HIDDEN), lambda i: (0, 0)),                # b2
            pl.BlockSpec((HIDDEN, OUT_FEATURES), lambda i: (0, 0)),     # w3
            pl.BlockSpec((1, OUT_FEATURES), lambda i: (0, 0)),          # b3
        ],
        out_specs=pl.BlockSpec((tb, OUT_FEATURES), lambda i: (i, 0)),
        compiler_params=pltpu.CompilerParams(
            dimension_semantics=("parallel",),          # v7x dual-TC sharding
        ),
        cost_estimate=pl.CostEstimate(
            flops=flops, transcendentals=0, bytes_accessed=bytes_accessed),
    )(x, w1, b1, w2, b2, w3, b3)

    return out


def init_params(key):
    """Deterministic init mirroring PyTorch Linear's U(-1/sqrt(fan_in), +...)."""
    def linear(key, fan_in, fan_out):
        kw, kb = jax.random.split(key)
        bound = 1.0 / jnp.sqrt(jnp.float32(fan_in))
        w = jax.random.uniform(kw, (fan_in, fan_out), jnp.float32,
                               minval=-bound, maxval=bound)
        b = jax.random.uniform(kb, (1, fan_out), jnp.float32,
                               minval=-bound, maxval=bound)
        return w, b

    k1, k2, k3 = jax.random.split(key, 3)
    w1, b1 = linear(k1, IN_FEATURES, HIDDEN)
    w2, b2 = linear(k2, HIDDEN, HIDDEN)
    w3, b3 = linear(k3, HIDDEN, OUT_FEATURES)
    return {"w1": w1, "b1": b1, "w2": w2, "b2": b2, "w3": w3, "b3": b3}


def reference_forward(x, p):
    h = jnp.maximum(x @ p["w1"] + p["b1"], 0.0)
    h = jnp.maximum(h @ p["w2"] + p["b2"], 0.0)
    return h @ p["w3"] + p["b3"]


if __name__ == "__main__":
    key = jax.random.PRNGKey(0)
    kp, kx = jax.random.split(key)

    params = init_params(kp)
    prepared = prepare_params(params)

    # Small batch (single tile, grid=1).
    x = jax.random.normal(kx, (8, IN_FEATURES), jnp.float32)
    out = jax.block_until_ready(dqn_forward(x, prepared))
    ref = reference_forward(x, params)
    assert out.shape == (8, OUT_FEATURES)
    # Tolerance accounts for bf16 matmuls/epilogue with f32 accumulation.
    # (If exact action parity with an f32 PyTorch DQN is required, an all-f32
    # path would cost essentially nothing wall-clock since the kernel is
    # memory-bound.)
    assert jnp.allclose(out, ref, atol=5e-2, rtol=5e-2), "mismatch vs reference"

    # Batch that spans multiple grid tiles and exercises the ragged last tile.
    xb = jax.random.normal(kx, (1000, IN_FEATURES), jnp.float32)
    outb = jax.block_until_ready(dqn_forward(xb, prepared))
    refb = reference_forward(xb, params)
    assert outb.shape == (1000, OUT_FEATURES)
    assert jnp.allclose(outb, refb, atol=5e-2, rtol=5e-2), "mismatch (batched)"

    print("KERNEL_OK")
</pallas_src>

<mosaic_0001>
module attributes {stable_mosaic.version = 11 : i64} {
  func.func @dqn_mlp_kernel(%arg0: i32, %arg1: memref<8x9xf32, #tpu.memory_space<vmem>>, %arg2: memref<9x128xbf16, #tpu.memory_space<vmem>>, %arg3: memref<1x128xbf16, #tpu.memory_space<vmem>>, %arg4: memref<128x128xbf16, #tpu.memory_space<vmem>>, %arg5: memref<1x128xbf16, #tpu.memory_space<vmem>>, %arg6: memref<128x9xbf16, #tpu.memory_space<vmem>>, %arg7: memref<1x9xf32, #tpu.memory_space<vmem>>, %arg8: memref<8x9xf32, #tpu.memory_space<vmem>>) attributes {dimension_semantics = [#tpu.dimension_semantics<parallel>], iteration_bounds = array<i64: 1>, scalar_prefetch = 0 : i64, scratch_operands = 0 : i64, tpu.core_type = #tpu.core_type<tc>, window_params = [{transform_indices = @transform_0, window_bounds = array<i64: 8, 9>}, {pipeline_mode = #tpu.pipeline_mode<synchronous>, transform_indices = @transform_1, window_bounds = array<i64: 9, 128>}, {pipeline_mode = #tpu.pipeline_mode<synchronous>, transform_indices = @transform_2, window_bounds = array<i64: 1, 128>}, {pipeline_mode = #tpu.pipeline_mode<synchronous>, transform_indices = @transform_3, window_bounds = array<i64: 128, 128>}, {pipeline_mode = #tpu.pipeline_mode<synchronous>, transform_indices = @transform_4, window_bounds = array<i64: 1, 128>}, {pipeline_mode = #tpu.pipeline_mode<synchronous>, transform_indices = @transform_5, window_bounds = array<i64: 128, 9>}, {pipeline_mode = #tpu.pipeline_mode<synchronous>, transform_indices = @transform_6, window_bounds = array<i64: 1, 9>}, {transform_indices = @transform_7, window_bounds = array<i64: 8, 9>}]} {
    %c0 = arith.constant 0 : index
    %c0_0 = arith.constant 0 : index
    %0 = vector.load %arg1[%c0, %c0_0] : memref<8x9xf32, #tpu.memory_space<vmem>>, vector<8x9xf32>
    %1 = arith.truncf %0 : vector<8x9xf32> to vector<8x9xbf16>
    %c0_1 = arith.constant 0 : index
    %c0_2 = arith.constant 0 : index
    %2 = vector.load %arg2[%c0_1, %c0_2] : memref<9x128xbf16, #tpu.memory_space<vmem>>, vector<9x128xbf16>
    %cst = arith.constant dense<0.000000e+00> : vector<8x128xf32>
    %3 = tpu.matmul %1, %2, %cst {dimension_numbers = #tpu.dot_dimension_numbers<[1], [0], [0], [1], [0, 0, 1, 1], [], []>} : vector<8x9xbf16>, vector<9x128xbf16>, vector<8x128xf32> -> vector<8x128xf32>
    %4 = arith.truncf %3 : vector<8x128xf32> to vector<8x128xbf16>
    %c0_3 = arith.constant 0 : index
    %c0_4 = arith.constant 0 : index
    %5 = vector.load %arg3[%c0_3, %c0_4] : memref<1x128xbf16, #tpu.memory_space<vmem>>, vector<1x128xbf16>
    %6 = vector.broadcast %5 : vector<1x128xbf16> to vector<8x128xbf16>
    %7 = arith.addf %4, %6 : vector<8x128xbf16>
    %cst_5 = arith.constant 0.000000e+00 : bf16
    %8 = vector.broadcast %cst_5 : bf16 to vector<8x128xbf16>
    %9 = arith.maximumf %7, %8 : vector<8x128xbf16>
    %c0_6 = arith.constant 0 : index
    %c0_7 = arith.constant 0 : index
    %10 = vector.load %arg4[%c0_6, %c0_7] : memref<128x128xbf16, #tpu.memory_space<vmem>>, vector<128x128xbf16>
    %cst_8 = arith.constant dense<0.000000e+00> : vector<8x128xf32>
    %11 = tpu.matmul %9, %10, %cst_8 {dimension_numbers = #tpu.dot_dimension_numbers<[1], [0], [0], [1], [0, 0, 1, 1], [], []>} : vector<8x128xbf16>, vector<128x128xbf16>, vector<8x128xf32> -> vector<8x128xf32>
    %12 = arith.truncf %11 : vector<8x128xf32> to vector<8x128xbf16>
    %c0_9 = arith.constant 0 : index
    %c0_10 = arith.constant 0 : index
    %13 = vector.load %arg5[%c0_9, %c0_10] : memref<1x128xbf16, #tpu.memory_space<vmem>>, vector<1x128xbf16>
    %14 = vector.broadcast %13 : vector<1x128xbf16> to vector<8x128xbf16>
    %15 = arith.addf %12, %14 : vector<8x128xbf16>
    %cst_11 = arith.constant 0.000000e+00 : bf16
    %16 = vector.broadcast %cst_11 : bf16 to vector<8x128xbf16>
    %17 = arith.maximumf %15, %16 : vector<8x128xbf16>
    %c0_12 = arith.constant 0 : index
    %c0_13 = arith.constant 0 : index
    %18 = vector.load %arg6[%c0_12, %c0_13] : memref<128x9xbf16, #tpu.memory_space<vmem>>, vector<128x9xbf16>
    %cst_14 = arith.constant dense<0.000000e+00> : vector<8x9xf32>
    %19 = tpu.matmul %17, %18, %cst_14 {dimension_numbers = #tpu.dot_dimension_numbers<[1], [0], [0], [1], [0, 0, 1, 1], [], []>} : vector<8x128xbf16>, vector<128x9xbf16>, vector<8x9xf32> -> vector<8x9xf32>
    %c0_15 = arith.constant 0 : index
    %c0_16 = arith.constant 0 : index
    %20 = vector.load %arg7[%c0_15, %c0_16] : memref<1x9xf32, #tpu.memory_space<vmem>>, vector<1x9xf32>
    %21 = vector.broadcast %20 : vector<1x9xf32> to vector<8x9xf32>
    %22 = arith.addf %19, %21 : vector<8x9xf32>
    %c0_17 = arith.constant 0 : index
    %c0_18 = arith.constant 0 : index
    %23 = vector.load %arg8[%c0_17, %c0_18] : memref<8x9xf32, #tpu.memory_space<vmem>>, vector<8x9xf32>
    tpu.vector_store %arg8[%c0_17, %c0_18], %22 {strides = array<i32>} : memref<8x9xf32, #tpu.memory_space<vmem>>, vector<8x9xf32>,
    return
  }
  func.func @transform_0(%arg0: i32) -> (i32, i32) {
    %c0_i32 = arith.constant 0 : i32
    %c0_i32_0 = arith.constant 0 : i32
    return %arg0, %c0_i32 : i32, i32
  }
  func.func @transform_1(%arg0: i32) -> (i32, i32) {
    %c0_i32 = arith.constant 0 : i32
    %c0_i32_0 = arith.constant 0 : i32
    %c0_i32_1 = arith.constant 0 : i32
    return %c0_i32, %c0_i32_0 : i32, i32
  }
  func.func @transform_2(%arg0: i32) -> (i32, i32) {
    %c0_i32 = arith.constant 0 : i32
    %c0_i32_0 = arith.constant 0 : i32
    %c0_i32_1 = arith.constant 0 : i32
    return %c0_i32, %c0_i32_0 : i32, i32
  }
  func.func @transform_3(%arg0: i32) -> (i32, i32) {
    %c0_i32 = arith.constant 0 : i32
    %c0_i32_0 = arith.constant 0 : i32
    %c0_i32_1 = arith.constant 0 : i32
    return %c0_i32, %c0_i32_0 : i32, i32
  }
  func.func @transform_4(%arg0: i32) -> (i32, i32) {
    %c0_i32 = arith.constant 0 : i32
    %c0_i32_0 = arith.constant 0 : i32
    %c0_i32_1 = arith.constant 0 : i32
    return %c0_i32, %c0_i32_0 : i32, i32
  }
  func.func @transform_5(%arg0: i32) -> (i32, i32) {
    %c0_i32 = arith.constant 0 : i32
    %c0_i32_0 = arith.constant 0 : i32
    %c0_i32_1 = arith.constant 0 : i32
    return %c0_i32, %c0_i32_0 : i32, i32
  }
  func.func @transform_6(%arg0: i32) -> (i32, i32) {
    %c0_i32 = arith.constant 0 : i32
    %c0_i32_0 = arith.constant 0 : i32
    %c0_i32_1 = arith.constant 0 : i32
    return %c0_i32, %c0_i32_0 : i32, i32
  }
  func.func @transform_7(%arg0: i32) -> (i32, i32) {
    %c0_i32 = arith.constant 0 : i32
    %c0_i32_0 = arith.constant 0 : i32
    return %arg0, %c0_i32 : i32, i32
  }
}

</mosaic_0001>

<bundles_post_ra>
// kernel: dqn_forward.1
= control target key start
LH: loop header
LB: loop body
LE: loop exit
PB: predicated region body
PF: predicated region fallthrough
CT: control target
= control target key end

     0   :  { %12 = vsyncpa [#allocation3], 0  ;;  %s670_s0 = inlined_call_operand.vmem [shape: f32[8,9], index: 0, kind: input, shape index: {}]   ;;  %s671_s1 = inlined_call_operand.hbm [shape: bf16[9,128], index: 1, kind: input, shape index: {}]   ;;  %s672_s2 = inlined_call_operand.vmem [shape: bf16[1,128], index: 2, kind: input, shape index: {}]   ;;  %s673_s3 = inlined_call_operand.vmem [shape: bf16[128,128], index: 3, kind: input, shape index: {}]   ;;  %s674_s4 = inlined_call_operand.vmem [shape: bf16[1,128], index: 4, kind: input, shape index: {}]   ;;  %s675_s5 = inlined_call_operand.vmem [shape: bf16[128,9], index: 5, kind: input, shape index: {}]   ;;  %s676_s6 = inlined_call_operand.vmem [shape: f32[1,9], index: 6, kind: input, shape index: {}]   ;;  %s677_s7 = inlined_call_operand.hbm [shape: f32[8,9], index: 7, kind: output, shape index: {}]  }
   0x1   :  { %13 = vsyncpa [#allocation4], 0  ;;  %s513_s24 = smov [#allocation2]   ;;  %s465_s28 = scalar_lea.hbm %s671_s1, 128 }
   0x2   :  { %s21_s25 = sshll.u32 %s513_s24, 4  ;;  %p466_p0 = scmp.ne.s32.totalorder %s671_s1, %s465_s28  ;;  %s22_s25 = int_to_ptr.vmem [resolvable:$true] %s21_s25 }
   0x3   :  { %p469_p1 = scmp.lt.u32.totalorder %s465_s28, %s671_s1 }
   0x5   :  { %p471_p2 = pnand %p469_p1, %p466_p0 }
   0x7   :  { %474 = shalt.err (!%p471_p2)
}
   0x8   :  { %s475_s10 = scalar_lea.vmem %s22_s25, 128  ;;  %p480_p4 = scmp.lt.s32.totalorder %s22_s25, %s22_s25 }
   0x9   :  { %p476_p3 = scmp.ne.s32.totalorder %s22_s25, %s475_s10  ;;  %p481_p5 = scmp.lt.s32.totalorder %s475_s10, %s475_s10 }
   0xb   :  { %p482_p6 = por %p481_p5, %p480_p4 }
   0xd   :  { %p483_p7 = pnand %p482_p6, %p476_p3 }
   0xf   :  { %486 = shalt.err (!%p483_p7)
}
  0x10   :  { %s514_s11 = smov 64   ;;  %s515_s12 = smov 4  }
  0x11   :  { %27 = dma.hbm_to_vmem [thread:$0]  %s671_s1, 128, %s22_s25, [#allocation3], %s514_s11, %s514_s11, %s515_s12  }
  0x12   :  { %509 = dma.done.wait [#allocation3], 128  }
  0x13   :  { %510 = vsyncadd [#allocation3], 4294967168  ;;  %vm55_vm0 = vcmask 1043456   ;;  %v516_v0 = vmov 0.0   ;;  %vm517_vm1 = vmmov 0   ;;  %vm56_vm2 = vcmask 1044480  }
  0x14   :  { %394 = vmatprep.subr.bf16.mxu0 %v516_v0  ;;  %400 = vmatprep.subr.bf16.mxu1 %v516_v0  ;;  %v518_v1 = vmov 65535   ;;  %v448_v4 = vld [vmem:[#allocation2] sm:$0x1f]   ;;  %vm51_vm3 = vcmask 72704   ;;  %v450_v9 = vld [vmem:[%s673_s3 + $0x8] sm:$0xff]   ;;  %v451_v10 = vld [vmem:[%s673_s3 + $0x10] sm:$0xff]   ;;  %v107_v22 = vlaneseq }
  0x15   :  { %396 = vmatprep.mubr.msk.bf16.mxu0 %vm517_vm1, %v516_v0  ;;  %416 = vmatprep.mubr.msk.bf16.mxu1 %vm517_vm1, %v516_v0  ;;  %v57_v2 = vsel %vm55_vm0, 4294967295, %v518_v1  ;;  %v42_v5 = vld [vmem:[%s670_s0] sm:$0xff]  ;;  %v452_v11 = vld [vmem:[%s673_s3 + $0x18] sm:$0xff]   ;;  %v454_v13 = vld [vmem:[%s673_s3 + $0x28] sm:$0xff]   ;;  %v519_v34 = vmov 0  }
  0x16   :  { %v58_v3 = vsel %vm56_vm2, %v57_v2, 0  ;;  %v449_v7 = vld [vmem:[%s673_s3] sm:$0xff]   ;;  %v43_v8 = vpack.c.bf16 %v42_v5, %v42_v5  ;;  %v455_v14 = vld [vmem:[%s673_s3 + $0x30] sm:$0xff]   ;;  %v456_v15 = vld [vmem:[%s673_s3 + $0x38] sm:$0xff]   ;;  %v108_v23 = vshrl.u32 %v107_v22, 7 }
  0x17   :  { %v60_v6 = vand.u32 %v448_v4, %v58_v3  ;;  %401 = vmatpush3.bf16.msra.mxu1 %v449_v7  ;;  %v453_v12 = vld [vmem:[%s673_s3 + $0x20] sm:$0xff]   ;;  %v458_v17 = vld [vmem:[%s675_s5 + $0x8] sm:$0xff]   ;;  %v459_v18 = vld [vmem:[%s675_s5 + $0x10] sm:$0xff]  }
  0x18   :  { %402 = vmatprep.subr.bf16.mxu1 %v516_v0  ;;  %v457_v16 = vld [vmem:[%s675_s5] sm:$0xff]   ;;  %v460_v19 = vld [vmem:[%s675_s5 + $0x18] sm:$0xff]   ;;  %v462_v21 = vld [vmem:[%s675_s5 + $0x28] sm:$0xff]   ;;  %v109_v26 = vsub.s32 0, %v108_v23 }
  0x19   :  { %395 = vmatpush3.bf16.msra.mxu0 %v60_v6  ;;  %v461_v20 = vld [vmem:[%s675_s5 + $0x20] sm:$0xff]   ;;  %v463_v36 = vld [vmem:[%s675_s5 + $0x30] sm:$0xff]   ;;  %v464_v37 = vld [vmem:[%s675_s5 + $0x38] sm:$0xff]   ;;  %s520_s5 = smov [#allocation5]  }
  0x1a   :  { %420 = vmatprep.subr.bf16.mxu0 %v516_v0  ;;  %v103_v24 = vld [vmem:[%s672_s2] sm:$0x1]  ;;  %s346_s26 = sshll.u32 %s520_s5, 4  ;;  %s347_s26 = int_to_ptr.vmem [resolvable:$true] %s346_s26 }
  0x1b   :  { %403 = vmatpush3.bf16.msra.mxu1 %v450_v9  ;;  %v105_v25 = vpack.i.b16 %v103_v24, %v103_v24  ;;  %v218_v38 = vld [vmem:[%s674_s4] sm:$0x1]  ;;  %s487_s4 = scalar_lea.vmem %s347_s26, 128  ;;  %p492_p9 = scmp.lt.s32.totalorder %s347_s26, %s347_s26 }
  0x1c   :  { %397 = vmatmul.mubr.msk.bf16.vlgmr.msra.gmra.mrb[0].mxu0 %vm51_vm3, %v43_v8  ;;  %404 = vmatprep.subr.bf16.mxu1 %v516_v0  ;;  %v220_v39 = vpack.i.b16 %v218_v38, %v218_v38  ;;  %v365_v48 = vld [vmem:[%s676_s6] ss:$0 sm:$0xff]  ;;  %p488_p8 = scmp.ne.s32.totalorder %s347_s26, %s487_s4  ;;  %p493_p10 = scmp.lt.s32.totalorder %s487_s4, %s487_s4 }
  0x1d   :  { %436 = vmatprep.mubr.msk.bf16.mxu0 %vm517_vm1, %v516_v0  ;;  %421 = vmatpush3.bf16.msra.mxu0 %v457_v16  ;;  %v110_v27 = vrot.slane %v105_v25, %v109_v26 }
  0x1e   :  { %422 = vmatprep.subr.bf16.mxu0 %v516_v0  ;;  %v225_v40 = vrot.slane %v220_v39, %v109_v26  ;;  %p494_p11 = por %p493_p10, %p492_p9 }
  0x1f   :  { %405 = vmatpush3.bf16.msra.mxu1 %v451_v10 }
  0x20   :  { %406 = vmatprep.subr.bf16.mxu1 %v516_v0  ;;  %p495_p12 = pnand %p494_p11, %p488_p8 }
  0x21   :  { %423 = vmatpush3.bf16.msra.mxu0 %v458_v17 }
  0x22   :  { %424 = vmatprep.subr.bf16.mxu0 %v516_v0 }
  0x23   :  { %407 = vmatpush3.bf16.msra.mxu1 %v452_v11 }
  0x24   :  { %408 = vmatprep.subr.bf16.mxu1 %v516_v0 }
  0x25   :  { %425 = vmatpush3.bf16.msra.mxu0 %v459_v18 }
  0x26   :  { %426 = vmatprep.subr.bf16.mxu0 %v516_v0 }
  0x27   :  { %409 = vmatpush3.bf16.msra.mxu1 %v453_v12 }
  0x28   :  { %410 = vmatprep.subr.bf16.mxu1 %v516_v0 }
  0x29   :  { %427 = vmatpush3.bf16.msra.mxu0 %v460_v19 }
  0x2a   :  { %428 = vmatprep.subr.bf16.mxu0 %v516_v0 }
  0x2b   :  { %411 = vmatpush3.bf16.msra.mxu1 %v454_v13 }
  0x2c   :  { %412 = vmatprep.subr.bf16.mxu1 %v516_v0 }
  0x2d   :  { %429 = vmatpush3.bf16.msra.mxu0 %v461_v20 }
  0x2e   :  { %430 = vmatprep.subr.bf16.mxu0 %v516_v0 }
  0x2f   :  { %413 = vmatpush3.bf16.msra.mxu1 %v455_v14 }
  0x30   :  { %414 = vmatprep.subr.bf16.mxu1 %v516_v0 }
  0x31   :  { %431 = vmatpush3.bf16.msra.mxu0 %v462_v21 }
  0x32   :  { %432 = vmatprep.subr.bf16.mxu0 %v516_v0 }
  0x33   :  { %415 = vmatpush3.bf16.msra.mxu1 %v456_v15 }
  0x35   :  { %433 = vmatpush3.bf16.msra.mxu0 %v463_v36 }
  0x36   :  { %434 = vmatprep.subr.bf16.mxu0 %v516_v0 }
  0x39   :  { %435 = vmatpush3.bf16.msra.mxu0 %v464_v37 }
  0xef   :  { %v96_v28 = vpop.f32.mrb[0].mxu0 }
  0xf0   :  { %v102_v29 = vpack.c.bf16 %v96_v28, %v96_v28  ;;  %v398_v30 = vpop.f32.mrb[1].mxu0 }
  0xf1   :  { %v99_v31 = vpop.f32.mrb[2].mxu0 }
  0xf2   :  { %v111_v32 = vadd.bf16 %v110_v27, %v102_v29  ;;  %v399_v33 = vpop.f32.mrb[3].mxu0 }
  0xf4   :  { %v112_v35 = vmax.bf16 %v519_v34, %v111_v32 }
  0xf6   :  { %417 = vmatmul.mubr.bf16.vlgmr.msra.gmra.mrb[0].mxu1 %v112_v35 }
 0x1c9   :  { %v211_v41 = vpop.f32.mrb[0].mxu1 }
 0x1ca   :  { %v217_v42 = vpack.c.bf16 %v211_v41, %v211_v41  ;;  %v418_v43 = vpop.f32.mrb[1].mxu1 }
 0x1cb   :  { %v214_v44 = vpop.f32.mrb[2].mxu1 }
 0x1cc   :  { %v226_v45 = vadd.bf16 %v225_v40, %v217_v42  ;;  %v419_v46 = vpop.f32.mrb[3].mxu1 }
 0x1ce   :  { %v227_v47 = vmax.bf16 %v519_v34, %v226_v45 }
 0x1d0   :  { %437 = vmatmul.mubr.bf16.vlgmr.msra.gmra.mrb[4].mxu0 %v227_v47 }
 0x2a3   :  { %v333_v49 = vpop.f32.mrb[4].mxu0 }
 0x2a4   :  { %v334_v50 = vadd.f32 %v365_v48, %v333_v49  ;;  %v438_v51 = vpop.f32.mrb[5].mxu0 }
 0x2a5   :  { %v336_v52 = vpop.f32.mrb[6].mxu0 }
 0x2a6   :  { %339 = vst.msk [vmem:[#allocation5] sm:$0xff] %vm51_vm3, %v334_v50  ;;  %v439_v53 = vpop.f32.mrb[7].mxu0 }
 0x2a7   :  { %498 = shalt.err (!%p495_p12)
}
 0x2a8   :  { %s499_s6 = scalar_lea.hbm %s677_s7, 128 }
 0x2a9   :  { %p500_p13 = scmp.ne.s32.totalorder %s677_s7, %s499_s6  ;;  %p503_p0 = scmp.lt.u32.totalorder %s499_s6, %s677_s7 }
 0x2ab   :  { %p505_p1 = pnand %p503_p0, %p500_p13 }
 0x2ad   :  { %508 = shalt.err (!%p505_p1)
}
 0x2ae   :  { %349 = dma.vmem_to_hbm [thread:$0]  %s347_s26, 128, %s677_s7, [#allocation4]  }
 0x2af   :  { %511 = dma.done.wait [#allocation4], 128  }
 0x2b0   :  { %512 = vsyncadd [#allocation4], 4294967168 }
 0x2b1   :  { %353 = vsyncpa [#allocation3], 1 }
 0x2b2   :  { %354 = vsyncpa [#allocation4], 1 }

</bundles_post_ra>
